<compile_context>
chip_gen: v5e
topology: v5e:2x2
jax: 0.10.0
libtpu: 0.0.40
codegen_flags: <defaults>
</compile_context>

<pallas_src>
import functools

import jax
import jax.numpy as jnp
from jax.experimental import pallas as pl
from jax.experimental.pallas import tpu as pltpu


_LANE = 128


def _vmem_budgets():
    """Generation-aware (vmem_limit_bytes, per-block byte budget)."""
    try:
        cap = int(pltpu.get_tpu_info().vmem_capacity_bytes)
    except Exception:
        cap = 64 * 1024 * 1024  # conservative (v7x-sized VMEM)
    vmem_limit = min(cap // 2, 64 * 1024 * 1024)  # 64 MiB v5e/v6e, 32 MiB v7x
    # in + out blocks, double-buffered (4 copies live), plus headroom.
    block_budget = vmem_limit // 8
    return vmem_limit, block_budget


def _largest_divisor_at_most(n: int, cap: int) -> int:
    cap = max(1, min(n, cap))
    for d in range(cap, 0, -1):
        if n % d == 0:
            return d
    return 1


# ---------------------------------------------------------------------------
# Primary path: index-map-driven shuffle, kernel is a pure unmasked copy.
# ---------------------------------------------------------------------------
def _copy_kernel(x_ref, o_ref):
    # The channel shuffle lives entirely in the BlockSpec index maps; the
    # vector path is one dense, unmasked full-block copy per grid step.
    o_ref[...] = x_ref[...]


def _shuffle_by_index_map(x: jax.Array, groups: int) -> jax.Array:
    b, c, h, w = x.shape
    hw = h * w
    cpg = c // groups
    itemsize = x.dtype.itemsize
    vmem_limit, block_budget = _vmem_budgets()

    # Spatial tile: largest multiple-of-128 divisor of hw that fits the budget.
    m = hw // _LANE
    cap_d = max(1, block_budget // (_LANE * cpg * itemsize))
    tile = _LANE * _largest_divisor_at_most(m, cap_d)
    nt = hw // tile

    # Batch tile: largest divisor of b that still fits the budget.
    cap_bt = max(1, block_budget // (cpg * tile * itemsize))
    bt = _largest_divisor_at_most(b, cap_bt)

    # Free (contiguous) views: x4[b, j, i, s] = x[b, j*cpg+i, s];
    # out3[b, i, j*hw+s] flattens to out[b, i*g+j, s].
    x4 = x.reshape(b, groups, cpg, hw)

    out3 = pl.pallas_call(
        _copy_kernel,
        out_shape=jax.ShapeDtypeStruct((b, cpg, groups * hw), x.dtype),
        grid_spec=pltpu.PrefetchScalarGridSpec(
            num_scalar_prefetch=0,
            grid=(b // bt, groups, nt),
            in_specs=[
                pl.BlockSpec((bt, None, cpg, tile),
                             lambda bi, j, ti: (bi, j, 0, ti)),
            ],
            out_specs=pl.BlockSpec((bt, cpg, tile),
                                   lambda bi, j, ti: (bi, 0, j * nt + ti)),
        ),
        compiler_params=pltpu.CompilerParams(
            dimension_semantics=("parallel", "parallel", "parallel"),
            vmem_limit_bytes=vmem_limit,
        ),
    )(x4)

    return out3.reshape(b, c, h, w)


# ---------------------------------------------------------------------------
# Fallback path (hw % 128 != 0): validated strided-sublane-store kernel,
# now with a VMEM-budget-aware spatial tile.
# ---------------------------------------------------------------------------
def _strided_shuffle_kernel(x_ref, o_ref, *, groups: int):
    """x_ref/o_ref blocks are (C, HW_TILE).

    For each source group j: one contiguous full-width load feeding one
    sublane-strided store to output rows {j, j+g, j+2g, ...}.
    """
    c = x_ref.shape[0]
    cpg = c // groups
    for j in range(groups):  # groups is small; static unroll
        o_ref[pl.ds(j, cpg, stride=groups), :] = x_ref[pl.ds(j * cpg, cpg), :]


def _shuffle_fallback(x: jax.Array, groups: int) -> jax.Array:
    b, c, h, w = x.shape
    hw = h * w
    itemsize = x.dtype.itemsize
    vmem_limit, block_budget = _vmem_budgets()

    # Honor the VMEM budget even for irregular hw (v7x has only 64 MiB VMEM).
    if c * hw * itemsize <= block_budget or hw <= _LANE:
        tile = hw  # full spatial extent: always a legal lane dim
    else:
        # Multiple-of-128 tile; remainder block is masked by Pallas (no need
        # for tile to divide hw exactly).
        tile = max(_LANE, (block_budget // (c * itemsize)) // _LANE * _LANE)

    x3 = x.reshape(b, c, hw)
    out3 = pl.pallas_call(
        functools.partial(_strided_shuffle_kernel, groups=groups),
        out_shape=jax.ShapeDtypeStruct((b, c, hw), x.dtype),
        grid_spec=pltpu.PrefetchScalarGridSpec(
            num_scalar_prefetch=0,
            grid=(b, pl.cdiv(hw, tile)),
            in_specs=[pl.BlockSpec((None, c, tile), lambda bi, ti: (bi, 0, ti))],
            out_specs=pl.BlockSpec((None, c, tile), lambda bi, ti: (bi, 0, ti)),
        ),
        compiler_params=pltpu.CompilerParams(
            dimension_semantics=("parallel", "parallel"),
            vmem_limit_bytes=vmem_limit,
        ),
    )(x3)
    return out3.reshape(b, c, h, w)


# ---------------------------------------------------------------------------
# Public wrapper
# ---------------------------------------------------------------------------
def shuffle_block(x: jax.Array, groups: int) -> jax.Array:
    """Channel shuffle matching torch ShuffleBlock(groups).forward for NCHW x."""
    b, c, h, w = x.shape
    assert c % groups == 0, "channels must be divisible by groups"
    if groups == 1:
        return x  # identity permutation
    if (h * w) % _LANE == 0:
        return _shuffle_by_index_map(x, groups)
    return _shuffle_fallback(x, groups)


def shuffle_block_ref(x: jax.Array, groups: int) -> jax.Array:
    """Pure-JAX reference mirroring the PyTorch view/permute/view."""
    b, c, h, w = x.shape
    g = groups
    return (
        x.reshape(b, g, c // g, h, w)
        .transpose(0, 2, 1, 3, 4)
        .reshape(b, c, h, w)
    )


if __name__ == "__main__":
    key = jax.random.PRNGKey(0)

    # Main case: b=2, c=4, 16x16, groups=2  (hw=256 -> index-map fast path).
    groups = 2
    b, c, h, w = 2, 4, 16, 16
    x = jax.random.normal(key, (b, c, h, w), dtype=jnp.float32)
    out = jax.block_until_ready(shuffle_block(x, groups))
    ref = shuffle_block_ref(x, groups)
    assert out.shape == (b, c, h, w)
    assert out.dtype == x.dtype
    assert jnp.array_equal(out, ref), "Pallas channel shuffle mismatch (g=2, 16x16)"

    # groups=3, non-multiple-of-8 channels, hw=128 (fast path).
    x2 = jax.random.normal(jax.random.PRNGKey(1), (1, 12, 8, 16), dtype=jnp.float32)
    out2 = jax.block_until_ready(shuffle_block(x2, 3))
    assert jnp.array_equal(out2, shuffle_block_ref(x2, 3)), "mismatch (g=3 case)"

    # Irregular spatial map (7x7 -> hw=49) exercises the fallback path.
    x3 = jax.random.normal(jax.random.PRNGKey(2), (2, 8, 7, 7), dtype=jnp.float32)
    out3 = jax.block_until_ready(shuffle_block(x3, 2))
    assert jnp.array_equal(out3, shuffle_block_ref(x3, 2)), "mismatch (fallback 7x7)"

    print("KERNEL_OK")
</pallas_src>

<mosaic_0001>
module attributes {stable_mosaic.version = 11 : i64} {
  func.func @_copy_kernel(%arg0: i32, %arg1: i32, %arg2: i32, %arg3: memref<2x1x2x256xf32, #tpu.memory_space<vmem>>, %arg4: memref<2x2x256xf32, #tpu.memory_space<vmem>>) attributes {dimension_semantics = [#tpu.dimension_semantics<parallel>, #tpu.dimension_semantics<parallel>, #tpu.dimension_semantics<parallel>], iteration_bounds = array<i64: 1, 2, 1>, scalar_prefetch = 0 : i64, scratch_operands = 0 : i64, tpu.core_type = #tpu.core_type<tc>, window_params = [{transform_indices = @transform_0, window_bounds = array<i64: 2, 1, 2, 256>}, {transform_indices = @transform_1, window_bounds = array<i64: 2, 2, 256>}]} {
    %c0 = arith.constant 0 : index
    %c0_0 = arith.constant 0 : index
    %c0_1 = arith.constant 0 : index
    %c0_2 = arith.constant 0 : index
    %0 = vector.load %arg3[%c0, %c0_0, %c0_1, %c0_2] : memref<2x1x2x256xf32, #tpu.memory_space<vmem>>, vector<2x1x2x256xf32>
    %1 = vector.shape_cast %0 : vector<2x1x2x256xf32> to vector<2x2x256xf32>
    %c0_3 = arith.constant 0 : index
    %c0_4 = arith.constant 0 : index
    %c0_5 = arith.constant 0 : index
    %2 = vector.load %arg4[%c0_3, %c0_4, %c0_5] : memref<2x2x256xf32, #tpu.memory_space<vmem>>, vector<2x2x256xf32>
    tpu.vector_store %arg4[%c0_3, %c0_4, %c0_5], %1 {strides = array<i32>} : memref<2x2x256xf32, #tpu.memory_space<vmem>>, vector<2x2x256xf32>,
    return
  }
  func.func @transform_0(%arg0: i32, %arg1: i32, %arg2: i32) -> (i32, i32, i32, i32) {
    %c0_i32 = arith.constant 0 : i32
    %c0_i32_0 = arith.constant 0 : i32
    return %arg0, %arg1, %c0_i32, %arg2 : i32, i32, i32, i32
  }
  func.func @transform_1(%arg0: i32, %arg1: i32, %arg2: i32) -> (i32, i32, i32) {
    %c1_i32 = arith.constant 1 : i32
    %0 = arith.muli %arg1, %c1_i32 : i32
    %1 = arith.addi %0, %arg2 : i32
    %c0_i32 = arith.constant 0 : i32
    %c0_i32_0 = arith.constant 0 : i32
    return %arg0, %c0_i32, %1 : i32, i32, i32
  }
}

</mosaic_0001>

<bundles_post_ra>
// kernel: tpu_custom_call.1
= control target key start
LH: loop header
LB: loop body
LE: loop exit
PB: predicated region body
PF: predicated region fallthrough
CT: control target
= control target key end

     0   :  { %6 = vsyncpa [#allocation3], 0  ;;  %s626_s0 = inlined_call_operand.hbm [shape: f32[2,2,2,256], index: 0, kind: input, shape index: {}]   ;;  %s627_s1 = inlined_call_operand.hbm [shape: f32[2,2,512], index: 1, kind: output, shape index: {}]  }
   0x1   :  { %8 = vsyncpa [#allocation3 + $0x1], 0 }
   0x2   :  { %9 = vsyncpa [#allocation4], 0 }
   0x3   :  { %11 = vsyncpa [#allocation4 + $0x1], 0  ;;  %s506_s6 = smov 0   ;;  %s508_s7 = smov 0  }
   0x4   :  { %s510_s8 = smov 0   ;;  %s512_s9 = smov 0  }
   0x5   :  { %s514_s10 = smov 0   ;;  %s516_s11 = smov 0  }
   0x6 LB: > { %s291_s12 = sadd.s32 4294967295, %s488_s11   ;;  %s292_s13 = sadd.s32 4294967294, %s488_s11   ;;  %s488_s11 = sphi %s516_s11, %s17_s11   ;;  %s484_s10 = sphi %s514_s10, %s636_s10   ;;  %s480_s9 = sphi %s512_s9, %s635_s9   ;;  %s476_s8 = sphi %s510_s8, %s634_s8   ;;  %s472_s7 = sphi %s508_s7, %s633_s7   ;;  %s468_s6 = sphi %s506_s6, %s632_s6  }
   0x7   : > { %s32_s14 = sadd.s32 1, %s484_s10  ;;  %s47_s15 = sadd.s32 1, %s476_s8 }
   0x8   : > { %p34_p0 = scmp.ge.s32.totalorder %s32_s14, 2  ;;  %p54_p1 = scmp.ne.s32.totalorder %s476_s8, %s472_s7 }
   0x9   : > { %p55_p2 = scmp.eq.s32.totalorder %s488_s11, 0  ;;  %p60_p3 = scmp.ne.s32.totalorder %s472_s7, %s468_s6 }
   0xa   : > { %s638_s14 = smov (%p34_p0, %s32_s14), 0  ;;  %p61_p5 = scmp.eq.s32.totalorder %s291_s12, 0 }
   0xb   : > { %p547_p4 = por %p55_p2, %p54_p1  ;;  %s41_s17 = ssub.s32 %s484_s10, %s638_s14 }
   0xc   : > { %p88_p6 = scmp.eq.s32.totalorder %s291_s12, 1  ;;  %p45_p7 = scmp.eq.s32.totalorder %s41_s17, 0 }
   0xd   : > { %p553_p8 = por %p61_p5, %p60_p3  ;;  %p94_p10 = scmp.eq.s32.totalorder %s292_s13, 1 }
   0xe   : > { %p557_p9 = por %p88_p6, %p54_p1  ;;  %p294_p12 = scmp.ge.s32.totalorder %s488_s11, 2 }
   0xf   : > { %s562_s20 = scalar_select %p45_p7, %s476_s8, %s47_s15  }
  0x10   : > { %p564_p11 = por %p94_p10, %p60_p3  ;;  %p320_p13 = scmp.lt.s32.totalorder %s488_s11, 2 }
  0x11   : > { %s114_s22 = sand.u32 1, %s476_s8   ;;  %s306_s24 = sshll.u32 %s484_s10, 2 }
  0x12   : > { %s295_s23 = sshll.u32 %s114_s22, 3  ;;  %s128_s27 = scalar_lea.hbm %s626_s0, %s306_s24 }
  0x13   : > { %s118_s28 = scalar_lea.vmem [#allocation2], %s295_s23  ;;  %s129_s30 = sshll.u32 %s128_s27, 4  ;;  %s130_s30 = int_to_ptr.hbm [resolvable:$true] %s129_s30 }
  0x14   : > { %s131_s29 = sshll.u32 %s118_s28, 4  ;;  %p313_p0 = pnand %p320_p13, %p547_p4  ;;  %s132_s29 = int_to_ptr.vmem [resolvable:$true] %s131_s29 }
  0x15   : > { %s115_s2 = scalar_lea.sflag [#allocation3], %s114_s22  ;;  %s490_s3 = smov 128  }
  0x16   : > { %s491_s4 = smov 64   ;;  %s492_s5 = smov 4  }
  0x17   : > { %315 = dma.hbm_to_vmem [thread:$0]  (!%p313_p0), %s130_s30, 128, %s132_s29, %s115_s2, %s490_s3, %s491_s4, %s492_s5  }
  0x18   : > { %p298_p1 = scmp.ge.s32.totalorder %s488_s11, 1  ;;  %p139_p2 = scmp.lt.s32.totalorder %s488_s11, 3 }
  0x1a   : > { %p140_p3 = pnand %p298_p1, %p139_p2 }
  0x1b   : > { %s580_s12 = sand.u32 (!%p140_p3), 1, %s472_s7  }
  0x1c   : > { %143 = sbr.rel (%p140_p3) target bundleno = 51 (0x33), region = 24  ;;  %s299_s13 = sshll.u32 (!%p140_p3), %s580_s12, 3 }
  0x1d   : > { %s146_s15 = scalar_lea.sflag (!%p140_p3), [#allocation3], %s580_s12  ;;  %s149_s17 = scalar_lea.vmem (!%p140_p3), [#allocation2], %s299_s13 }
  0x21   : > { %459 = dma.done.wait (%p553_p8), %s146_s15, 128  }
  0x22   : > { %461 = vsyncadd (%p553_p8), %s146_s15, 4294967168  ;;  %s168_s16 = scalar_lea.vmem [#allocation5], %s299_s13  ;;  %s307_s23 = sshll.u32 %s480_s9, 2  ;;  %v174_v0 = vld [vmem:[%s149_s17] sm:$0xff]  }
  0x23   : > { %s195_s22 = sshll.u32 %s168_s16, 4  ;;  %s194_s26 = scalar_lea.hbm %s627_s1, %s307_s23  ;;  %176 = vst [vmem:[%s168_s16] sm:$0xff] %v174_v0   ;;  %s196_s22 = int_to_ptr.vmem [resolvable:$true] %s195_s22 }
  0x24   : > { %s197_s27 = sshll.u32 %s194_s26, 4  ;;  %s179_s28 = scalar_lea.sflag [#allocation4], %s580_s12  ;;  %s198_s27 = int_to_ptr.hbm [resolvable:$true] %s197_s27 }
  0x25   : > { %s420_s29 = sshra.s32 %s198_s27, 4  ;;  %s426_s9 = scalar_lea.hbm %s627_s1, 16  ;;  %s421_s29 = int_to_ptr.hbm [resolvable:$true] %s420_s29 }
  0x26   : > { %s422_s18 = scalar_lea.hbm %s421_s29, 8  ;;  %p427_p7 = scmp.lt.s32.totalorder %s421_s29, %s627_s1 }
  0x27   : > { %p423_p4 = scmp.ne.s32.totalorder %s421_s29, %s422_s18  ;;  %p428_p8 = scmp.lt.s32.totalorder %s426_s9, %s422_s18 }
  0x29   : > { %p424_p5 = pnand %p423_p4, %p557_p9  ;;  %p429_p10 = por %p428_p8, %p427_p7 }
  0x2b   : > { %p425_p6 = pneg %p424_p5 }
  0x2d   : > { %p430_p13 = pnand %p429_p10, %p425_p6 }
  0x2f   : > { %433 = shalt.err (!%p430_p13)
}
  0x30   : > { %s493_s5 = smov 64   ;;  %s494_s12 = smov 128  }
  0x31   : > { %s495_s13 = smov 4  }
  0x32   : > { %310 = dma.vmem_to_hbm [thread:$0]  (%p557_p9), %s196_s22, 128, %s198_s27, %s179_s28, %s493_s5, %s494_s12, %s495_s13  }
  0x33 PF: > { %s212_s15 = sand.u32 1, %s468_s6   ;;  %p317_p0 = pnand %p294_p12, %p564_p11 }
  0x34   : > { %s213_s17 = scalar_lea.sflag [#allocation4], %s212_s15 }
  0x35   : > { %p318_p1 = pneg %p317_p0 }
  0x37   : > { %463 = dma.done.wait (%p318_p1), %s213_s17, 128  }
  0x38   : > { %465 = vsyncadd (%p318_p1), %s213_s17, 4294967168  ;;  %s17_s11 = sadd.s32 1, %s488_s11   ;;  %s632_s6 = smov %s472_s7 }
  0x39   : > { %p14_p2 = scmp.ge.s32.totalorder %s17_s11, 4   ;;  %s633_s7 = smov %s476_s8 }
  0x3a   : > { %s634_s8 = smov %s562_s20  ;;  %s635_s9 = smov %s484_s10 }
  0x3b   : > { %s636_s10 = smov %s638_s14  ;;  %16 = sbr.rel (!%p14_p2) target bundleno = 6 (0x6), region = 69 }
  0x40   :  { %219 = vsyncpa [#allocation3], 1 }
  0x41   :  { %221 = vsyncpa [#allocation3 + $0x1], 1 }
  0x42   :  { %222 = vsyncpa [#allocation4], 1 }
  0x43   :  { %224 = vsyncpa [#allocation4 + $0x1], 1 }

</bundles_post_ra>
